<compile_context>
chip_gen: v6e
topology: v6e:2x2x1
jax: 0.10.0
libtpu: 0.0.40
codegen_flags: <defaults>
</compile_context>

<pallas_src>
import functools

import jax
import jax.numpy as jnp
from jax.experimental import pallas as pl
from jax.experimental.pallas import tpu as pltpu


def _round_up(x, m):
    return ((x + m - 1) // m) * m


# ---------------------------------------------------------------------------
# Generic fused Linear + activation kernel: one (tm, tn) output tile,
# accumulated over the K grid axis in an f32 VMEM scratch.
# ---------------------------------------------------------------------------
def _linear_act_kernel(x_ref, w_ref, b_ref, o_ref, acc_ref, *, activation):
    k = pl.program_id(2)

    @pl.when(k == 0)
    def _():
        acc_ref[...] = jnp.zeros_like(acc_ref)

    acc_ref[...] += jnp.dot(x_ref[...], w_ref[...],
                            preferred_element_type=jnp.float32)

    @pl.when(k == pl.num_programs(2) - 1)
    def _():
        z = acc_ref[...] + b_ref[...]          # f32 bias, broadcast (1,tn)->(tm,tn)
        if activation == "relu":
            z = jnp.maximum(z, 0.0)
        elif activation == "sigmoid":
            z = jax.nn.sigmoid(z)
        # activation == "none": identity
        o_ref[...] = z.astype(o_ref.dtype)


def linear_act(x, w_t, b, *, activation="none",
               compute_dtype=jnp.bfloat16, tm=256, tn=256, tk=512):
    """act(x @ w_t + b) as a tiled Pallas TPU kernel.

    x:   [B, fin]       float32
    w_t: [fin, fout]    weight stored pre-transposed at parameter-init time
    b:   [fout]         float32
    Returns float32 [B, fout].
    """
    B, fin = x.shape
    fin_w, fout = w_t.shape
    assert fin_w == fin

    # Clamp tiles to the (padded) problem so tiny layers still satisfy the
    # (8, 128) divisibility rule while large layers get 256/512-wide tiles.
    tm = min(tm, _round_up(B, 8))
    tn = min(tn, _round_up(fout, 128))       # lane-dense output tiles
    tk = min(tk, _round_up(fin, 128))

    Bp = _round_up(B, tm)
    fout_p = _round_up(fout, tn)
    fin_p = _round_up(fin, tk)

    # Zero padding: padded-K columns contribute exactly 0 to the dot product.
    xp = jnp.zeros((Bp, fin_p), dtype=compute_dtype).at[:B, :fin].set(
        x.astype(compute_dtype))
    wp = jnp.zeros((fin_p, fout_p), dtype=compute_dtype).at[:fin, :fout].set(
        w_t.astype(compute_dtype))
    bp = jnp.zeros((1, fout_p), dtype=jnp.float32).at[0, :fout].set(
        b.astype(jnp.float32))

    gm, gn, gk = Bp // tm, fout_p // tn, fin_p // tk

    itemsize = jnp.dtype(compute_dtype).itemsize
    est_vmem = (2 * (tm * tk + tk * tn) * itemsize   # double-buffered inputs
                + 2 * tm * tn * 4                    # double-buffered output
                + tm * tn * 4                        # f32 accumulator
                + 2 * tn * 4)                        # bias
    # Explicit limit, kept well under v7x's 64 MiB physical VMEM.
    vmem_limit = int(min(max(2 * est_vmem, 16 * 1024 * 1024),
                         48 * 1024 * 1024))

    cost = pl.CostEstimate(
        flops=2 * Bp * fin_p * fout_p,
        transcendentals=Bp * fout_p if activation == "sigmoid" else 0,
        bytes_accessed=(Bp * fin_p + fin_p * fout_p) * itemsize
                       + Bp * fout_p * 4 + fout_p * 4,
    )

    out = pl.pallas_call(
        functools.partial(_linear_act_kernel, activation=activation),
        out_shape=jax.ShapeDtypeStruct((Bp, fout_p), jnp.float32),
        grid_spec=pltpu.PrefetchScalarGridSpec(
            num_scalar_prefetch=0,
            grid=(gm, gn, gk),
            in_specs=[
                pl.BlockSpec((tm, tk), lambda i, j, k: (i, k)),
                pl.BlockSpec((tk, tn), lambda i, j, k: (k, j)),
                pl.BlockSpec((1, tn), lambda i, j, k: (0, j)),
            ],
            out_specs=pl.BlockSpec((tm, tn), lambda i, j, k: (i, j)),
            scratch_shapes=[pltpu.VMEM((tm, tn), jnp.float32)],
        ),
        compiler_params=pltpu.CompilerParams(
            dimension_semantics=("parallel", "parallel", "arbitrary"),
            vmem_limit_bytes=vmem_limit,
        ),
        cost_estimate=cost,
    )(xp, wp, bp)

    return out[:B, :fout]


# ---------------------------------------------------------------------------
# VaDE parameters (weights kept pre-transposed as [fin, fout]) and forward.
# ---------------------------------------------------------------------------
def _init_linear(key, fin, fout, zero=False, bias_init=0.0):
    """nn.Linear-style init; weight returned pre-transposed as [fin, fout]."""
    if zero:
        return (jnp.zeros((fin, fout), jnp.float32),
                jnp.full((fout,), bias_init, jnp.float32))
    kw, kb = jax.random.split(key)
    bound = 1.0 / (fin ** 0.5)
    w_t = jax.random.uniform(kw, (fin, fout), minval=-bound, maxval=bound,
                             dtype=jnp.float32)
    b = jax.random.uniform(kb, (fout,), minval=-bound, maxval=bound,
                           dtype=jnp.float32) + bias_init
    return w_t, b


def init_vade_params(key, n_neurons, latent_logvar_bias_init=-5.0):
    L = len(n_neurons) - 1
    keys = jax.random.split(key, 2 * L + 2)
    ki = iter(range(len(keys)))
    params = {}
    # self.encoder = encoder[:-1]  -> Linear+ReLU stack over n_neurons[:-1]
    params["encoder"] = [
        _init_linear(keys[next(ki)], n_neurons[i], n_neurons[i + 1])
        for i in range(L - 1)
    ]
    # LatentDistribution(n_neurons[-2], n_neurons[-1])
    params["mu_fc"] = _init_linear(keys[next(ki)], n_neurons[-2], n_neurons[-1])
    # logvar_fc: zero weight / zero bias, then bias += latent_logvar_bias_init
    params["logvar_fc"] = _init_linear(keys[next(ki)], n_neurons[-2],
                                       n_neurons[-1], zero=True,
                                       bias_init=latent_logvar_bias_init)
    rev = n_neurons[::-1]
    # self.decoder = decoder[:-1]  -> Linear+ReLU stack over reversed neurons
    params["decoder"] = [
        _init_linear(keys[next(ki)], rev[i], rev[i + 1])
        for i in range(L - 1)
    ]
    # out_dist = BernoulliDistribution(n_neurons[1], n_neurons[0])
    params["out"] = _init_linear(keys[next(ki)], n_neurons[1], n_neurons[0])
    return params


def vade_forward(params, bx, eps):
    """Pallas VaDE.forward: returns the Bernoulli probs of shape (B, 1, D0)."""
    h = bx
    for w_t, b in params["encoder"]:
        h = linear_act(h, w_t, b, activation="relu")
    mu = linear_act(h, params["mu_fc"][0], params["mu_fc"][1], activation="none")
    logvar = linear_act(h, params["logvar_fc"][0], params["logvar_fc"][1],
                        activation="none")
    sigma = jnp.exp(0.5 * logvar)
    z = mu + sigma * eps                       # reparameterized rsample
    d = z
    for w_t, b in params["decoder"]:
        d = linear_act(d, w_t, b, activation="relu")
    probs = linear_act(d, params["out"][0], params["out"][1],
                       activation="sigmoid")
    # torch builds D.Bernoulli over (B, 1, D0)-shaped activations (unsqueeze(1))
    return probs[:, None, :]


# ---------------------------------------------------------------------------
# Pure-JAX reference (same bf16 MXU casting, same math) for the demo check.
# ---------------------------------------------------------------------------
def _ref_linear(x, w_t, b, activation, compute_dtype=jnp.bfloat16):
    z = jnp.dot(x.astype(compute_dtype), w_t.astype(compute_dtype),
                preferred_element_type=jnp.float32) + b.astype(jnp.float32)
    if activation == "relu":
        z = jnp.maximum(z, 0.0)
    elif activation == "sigmoid":
        z = jax.nn.sigmoid(z)
    return z


def vade_forward_ref(params, bx, eps):
    h = bx
    for w_t, b in params["encoder"]:
        h = _ref_linear(h, w_t, b, "relu")
    mu = _ref_linear(h, params["mu_fc"][0], params["mu_fc"][1], "none")
    logvar = _ref_linear(h, params["logvar_fc"][0], params["logvar_fc"][1], "none")
    sigma = jnp.exp(0.5 * logvar)
    z = mu + sigma * eps
    d = z
    for w_t, b in params["decoder"]:
        d = _ref_linear(d, w_t, b, "relu")
    probs = _ref_linear(d, params["out"][0], params["out"][1], "sigmoid")
    return probs[:, None, :]


if __name__ == "__main__":
    key = jax.random.PRNGKey(0)
    # Small shapes consistent with VaDE's MLP structure ([784,512,256,10] in the paper).
    n_neurons = [64, 32, 16, 8]
    batch = 8

    kp, kx, ke = jax.random.split(key, 3)
    params = init_vade_params(kp, n_neurons)
    bx = jax.random.uniform(kx, (batch, n_neurons[0]), dtype=jnp.float32)
    eps = jax.random.normal(ke, (batch, n_neurons[-1]), dtype=jnp.float32)

    probs = vade_forward(params, bx, eps)
    jax.block_until_ready(probs)

    ref = vade_forward_ref(params, bx, eps)
    assert probs.shape == (batch, 1, n_neurons[0])
    assert bool(jnp.all(jnp.isfinite(probs)))
    assert bool(jnp.all((probs >= 0.0) & (probs <= 1.0)))
    assert bool(jnp.allclose(probs, ref, atol=1e-3, rtol=1e-3))

    print("KERNEL_OK")
</pallas_src>

<mosaic_0001>
module attributes {stable_mosaic.version = 11 : i64} {
  func.func @_linear_act_kernel(%arg0: i32, %arg1: i32, %arg2: i32, %arg3: memref<8x128xbf16, #tpu.memory_space<vmem>>, %arg4: memref<128x128xbf16, #tpu.memory_space<vmem>>, %arg5: memref<1x128xf32, #tpu.memory_space<vmem>>, %arg6: memref<8x128xf32, #tpu.memory_space<vmem>>, %arg7: memref<8x128xf32, #tpu.memory_space<vmem>>) attributes {dimension_semantics = [#tpu.dimension_semantics<parallel>, #tpu.dimension_semantics<parallel>, #tpu.dimension_semantics<arbitrary>], iteration_bounds = array<i64: 1, 1, 1>, scalar_prefetch = 0 : i64, scratch_operands = 1 : i64, tpu.core_type = #tpu.core_type<tc>, window_params = [{transform_indices = @transform_0, window_bounds = array<i64: 8, 128>}, {transform_indices = @transform_1, window_bounds = array<i64: 128, 128>}, {transform_indices = @transform_2, window_bounds = array<i64: 1, 128>}, {transform_indices = @transform_3, window_bounds = array<i64: 8, 128>}]} {
    %c0_i32 = arith.constant 0 : i32
    %0 = arith.cmpi eq, %arg2, %c0_i32 : i32
    %1 = arith.extui %0 : i1 to i32
    %c0_i32_0 = arith.constant 0 : i32
    %2 = arith.cmpi ne, %1, %c0_i32_0 : i32
    scf.if %2 {
      %cst_10 = arith.constant 0.000000e+00 : f32
      %12 = vector.broadcast %cst_10 : f32 to vector<8x128xf32>
      %c0_11 = arith.constant 0 : index
      %c0_12 = arith.constant 0 : index
      %13 = vector.load %arg7[%c0_11, %c0_12] : memref<8x128xf32, #tpu.memory_space<vmem>>, vector<8x128xf32>
      tpu.vector_store %arg7[%c0_11, %c0_12], %12 {strides = array<i32>} : memref<8x128xf32, #tpu.memory_space<vmem>>, vector<8x128xf32>,
    } else {
    }
    %c0 = arith.constant 0 : index
    %c0_1 = arith.constant 0 : index
    %3 = vector.load %arg7[%c0, %c0_1] : memref<8x128xf32, #tpu.memory_space<vmem>>, vector<8x128xf32>
    %c0_2 = arith.constant 0 : index
    %c0_3 = arith.constant 0 : index
    %4 = vector.load %arg3[%c0_2, %c0_3] : memref<8x128xbf16, #tpu.memory_space<vmem>>, vector<8x128xbf16>
    %c0_4 = arith.constant 0 : index
    %c0_5 = arith.constant 0 : index
    %5 = vector.load %arg4[%c0_4, %c0_5] : memref<128x128xbf16, #tpu.memory_space<vmem>>, vector<128x128xbf16>
    %cst = arith.constant dense<0.000000e+00> : vector<8x128xf32>
    %6 = tpu.matmul %4, %5, %cst {dimension_numbers = #tpu.dot_dimension_numbers<[1], [0], [0], [1], [0, 0, 1, 1], [], []>} : vector<8x128xbf16>, vector<128x128xbf16>, vector<8x128xf32> -> vector<8x128xf32>
    %7 = arith.addf %3, %6 : vector<8x128xf32>
    %c0_6 = arith.constant 0 : index
    %c0_7 = arith.constant 0 : index
    %8 = vector.load %arg7[%c0_6, %c0_7] : memref<8x128xf32, #tpu.memory_space<vmem>>, vector<8x128xf32>
    tpu.vector_store %arg7[%c0_6, %c0_7], %7 {strides = array<i32>} : memref<8x128xf32, #tpu.memory_space<vmem>>, vector<8x128xf32>,
    %c0_i32_8 = arith.constant 0 : i32
    %9 = arith.cmpi eq, %arg2, %c0_i32_8 : i32
    %10 = arith.extui %9 : i1 to i32
    %c0_i32_9 = arith.constant 0 : i32
    %11 = arith.cmpi ne, %10, %c0_i32_9 : i32
    scf.if %11 {
      %c0_10 = arith.constant 0 : index
      %c0_11 = arith.constant 0 : index
      %12 = vector.load %arg7[%c0_10, %c0_11] : memref<8x128xf32, #tpu.memory_space<vmem>>, vector<8x128xf32>
      %c0_12 = arith.constant 0 : index
      %c0_13 = arith.constant 0 : index
      %13 = vector.load %arg5[%c0_12, %c0_13] : memref<1x128xf32, #tpu.memory_space<vmem>>, vector<1x128xf32>
      %14 = vector.broadcast %13 : vector<1x128xf32> to vector<8x128xf32>
      %15 = arith.addf %12, %14 : vector<8x128xf32>
      %cst_14 = arith.constant 0.000000e+00 : f32
      %16 = vector.broadcast %cst_14 : f32 to vector<8x128xf32>
      %17 = arith.maximumf %15, %16 : vector<8x128xf32>
      %c0_15 = arith.constant 0 : index
      %c0_16 = arith.constant 0 : index
      %18 = vector.load %arg6[%c0_15, %c0_16] : memref<8x128xf32, #tpu.memory_space<vmem>>, vector<8x128xf32>
      tpu.vector_store %arg6[%c0_15, %c0_16], %17 {strides = array<i32>} : memref<8x128xf32, #tpu.memory_space<vmem>>, vector<8x128xf32>,
    } else {
    }
    return
  }
  func.func @transform_0(%arg0: i32, %arg1: i32, %arg2: i32) -> (i32, i32) {
    %c0_i32 = arith.constant 0 : i32
    return %arg0, %arg2 : i32, i32
  }
  func.func @transform_1(%arg0: i32, %arg1: i32, %arg2: i32) -> (i32, i32) {
    %c0_i32 = arith.constant 0 : i32
    return %arg2, %arg1 : i32, i32
  }
  func.func @transform_2(%arg0: i32, %arg1: i32, %arg2: i32) -> (i32, i32) {
    %c0_i32 = arith.constant 0 : i32
    %c0_i32_0 = arith.constant 0 : i32
    return %c0_i32, %arg1 : i32, i32
  }
  func.func @transform_3(%arg0: i32, %arg1: i32, %arg2: i32) -> (i32, i32) {
    %c0_i32 = arith.constant 0 : i32
    return %arg0, %arg1 : i32, i32
  }
}

</mosaic_0001>

<bundles_post_ra>
// kernel: tpu_custom_call.1
= control target key start
LH: loop header
LB: loop body
LE: loop exit
PB: predicated region body
PF: predicated region fallthrough
CT: control target
= control target key end

     0   :  { %8 = vsyncpa [#allocation4], 0  ;;  %s343_s0 = inlined_call_operand.hbm [shape: bf16[8,128], index: 0, kind: input, shape index: {}]   ;;  %s344_s1 = inlined_call_operand.hbm [shape: bf16[128,128], index: 1, kind: input, shape index: {}]   ;;  %s345_s2 = inlined_call_operand.vmem [shape: f32[1,128], index: 2, kind: input, shape index: {}]   ;;  %s346_s3 = inlined_call_operand.hbm [shape: f32[8,128], index: 3, kind: output, shape index: {}]  }
   0x1   :  { %9 = vsyncpa [#allocation7], 0 }
   0x2   :  { %10 = vsyncpa [#allocation5], 0  ;;  %s304_s12 = smov [#allocation3]   ;;  %s305_s14 = smov [#allocation6]  }
   0x3   :  { %s17_s13 = sshll.u32 %s304_s12, 4  ;;  %s26_s15 = sshll.u32 %s305_s14, 4  ;;  %s18_s13 = int_to_ptr.vmem [resolvable:$true] %s17_s13  ;;  %s27_s15 = int_to_ptr.vmem [resolvable:$true] %s26_s15 }
   0x4   :  { %s246_s16 = scalar_lea.vmem %s18_s13, 64  ;;  %p251_p1 = scmp.lt.s32.totalorder %s18_s13, %s18_s13 }
   0x5   :  { %p247_p0 = scmp.ne.s32.totalorder %s18_s13, %s246_s16  ;;  %p252_p2 = scmp.lt.s32.totalorder %s246_s16, %s246_s16 }
   0x7   :  { %p253_p3 = por %p252_p2, %p251_p1 }
   0x9   :  { %p254_p4 = pnand %p253_p3, %p247_p0 }
   0xb   :  { %257 = shalt.err (!%p254_p4)
}
   0xc   :  { %20 = dma.hbm_to_vmem [thread:$0]  %s343_s0, 64, %s18_s13, [#allocation4]  }
   0xd   :  { %s266_s19 = scalar_lea.vmem %s27_s15, 1024  ;;  %p271_p6 = scmp.lt.s32.totalorder %s27_s15, %s27_s15 }
   0xe   :  { %p267_p5 = scmp.ne.s32.totalorder %s27_s15, %s266_s19  ;;  %p272_p7 = scmp.lt.s32.totalorder %s266_s19, %s266_s19 }
  0x10   :  { %p273_p8 = por %p272_p7, %p271_p6 }
  0x12   :  { %p274_p9 = pnand %p273_p8, %p267_p5 }
  0x14   :  { %277 = shalt.err (!%p274_p9)
}
  0x15   :  { %s306_s20 = smov 64   ;;  %s307_s21 = smov 4  }
  0x16   :  { %32 = dma.hbm_to_vmem [thread:$0]  %s344_s1, 1024, %s27_s15, [#allocation7], %s306_s20, %s306_s20, %s307_s21  }
  0x17   :  { %298 = dma.done.wait [#allocation4], 64  }
  0x18   :  { %299 = vsyncadd [#allocation4], 4294967232 }
  0x19   :  { %300 = dma.done.wait [#allocation7], 1024  }
  0x1a   :  { %301 = vsyncadd [#allocation7], 4294966272  ;;  %v308_v0 = vmov 0.0   ;;  %vm309_vm0 = vmmov 0   ;;  %v230_v1 = vld [vmem:[#allocation6 + $0x38] sm:$0xff]   ;;  %v231_v2 = vld [vmem:[#allocation6 + $0x30] sm:$0xff]  }
  0x1b   :  { %203 = vmatprep.subr.bf16.mxu0 %v308_v0  ;;  %219 = vmatprep.mubr.msk.bf16.mxu0 %vm309_vm0, %v308_v0  ;;  %v232_v3 = vld [vmem:[#allocation6 + $0x28] sm:$0xff]   ;;  %v233_v4 = vld [vmem:[#allocation6 + $0x20] sm:$0xff]   ;;  %v234_v5 = vld [vmem:[#allocation6 + $0x18] sm:$0xff]   ;;  %s310_s24 = smov [#allocation8]  }
  0x1c   :  { %204 = vmatpush3.bf16.msra.mxu0 %v230_v1  ;;  %v235_v6 = vld [vmem:[#allocation6 + $0x10] sm:$0xff]   ;;  %v236_v7 = vld [vmem:[#allocation6 + $0x8] sm:$0xff]   ;;  %v237_v8 = vld [vmem:[#allocation6] sm:$0xff]   ;;  %s175_s25 = sshll.u32 %s310_s24, 4  ;;  %s176_s25 = int_to_ptr.vmem [resolvable:$true] %s175_s25 }
  0x1d   :  { %205 = vmatprep.subr.bf16.mxu0 %v308_v0  ;;  %v48_v9 = vld [vmem:[#allocation3] sm:$0xf]  ;;  %s278_s26 = scalar_lea.vmem %s176_s25, 128  ;;  %p283_p11 = scmp.lt.s32.totalorder %s176_s25, %s176_s25 }
  0x1e   :  { %v193_v10 = vld [vmem:[%s345_s2] ss:$0 sm:$0xff]  ;;  %p279_p10 = scmp.ne.s32.totalorder %s176_s25, %s278_s26  ;;  %p284_p12 = scmp.lt.s32.totalorder %s278_s26, %s278_s26 }
  0x20   :  { %206 = vmatpush3.bf16.msra.mxu0 %v231_v2  ;;  %p285_p13 = por %p284_p12, %p283_p11 }
  0x21   :  { %207 = vmatprep.subr.bf16.mxu0 %v308_v0 }
  0x22   :  { %p286_p0 = pnand %p285_p13, %p279_p10 }
  0x24   :  { %208 = vmatpush3.bf16.msra.mxu0 %v232_v3 }
  0x25   :  { %209 = vmatprep.subr.bf16.mxu0 %v308_v0 }
  0x28   :  { %210 = vmatpush3.bf16.msra.mxu0 %v233_v4 }
  0x29   :  { %211 = vmatprep.subr.bf16.mxu0 %v308_v0 }
  0x2c   :  { %212 = vmatpush3.bf16.msra.mxu0 %v234_v5 }
  0x2d   :  { %213 = vmatprep.subr.bf16.mxu0 %v308_v0 }
  0x30   :  { %214 = vmatpush3.bf16.msra.mxu0 %v235_v6 }
  0x31   :  { %215 = vmatprep.subr.bf16.mxu0 %v308_v0 }
  0x34   :  { %216 = vmatpush3.bf16.msra.mxu0 %v236_v7 }
  0x35   :  { %217 = vmatprep.subr.bf16.mxu0 %v308_v0 }
  0x38   :  { %218 = vmatpush3.bf16.msra.mxu0 %v237_v8 }
  0x3b   :  { %220 = vmatmul.mubr.bf16.vlgmr.msra.gmra.mxu0 %v48_v9 }
  0xfb   :  { %v147_v11 = vpop.f32.mrf.mxu0 }
  0xfc   :  { %v166_v12 = vadd.f32 %v193_v10, %v147_v11 }
  0xfd   :  { %v221_v13 = vpop.f32.mrf.mxu0 }
  0xfe   :  { %v167_v14 = vmax.f32 %v166_v12, 0.0 }
  0xff   :  { %v150_v15 = vpop.f32.mrf.mxu0 }
 0x100   :  { %168 = vst [vmem:[#allocation8] sm:$0xff] %v167_v14 }
 0x101   :  { %v222_v16 = vpop.f32.mrf.mxu0 }
 0x102   :  { %289 = shalt.err (!%p286_p0)
}
 0x103   :  { %178 = dma.vmem_to_hbm [thread:$0]  %s176_s25, 128, %s346_s3, [#allocation5]  }
 0x104   :  { %302 = dma.done.wait [#allocation5], 128  }
 0x105   :  { %303 = vsyncadd [#allocation5], 4294967168 }
 0x106   :  { %182 = vsyncpa [#allocation4], 1 }
 0x107   :  { %183 = vsyncpa [#allocation7], 1 }
 0x108   :  { %184 = vsyncpa [#allocation5], 1 }

</bundles_post_ra>
